<compile_context>
chip_gen: v7x
topology: tpu7x:2x2x1
jax: 0.10.0
libtpu: 0.0.40
codegen_flags: <defaults>
</compile_context>

<pallas_src>
from typing import NamedTuple

import jax
import jax.numpy as jnp
from jax.experimental import pallas as pl
from jax.experimental.pallas import tpu as pltpu


def _round_up(x, m):
    return ((x + m - 1) // m) * m


def _vmem_capacity_bytes():
    """Physical VMEM capacity; conservative (v7x-sized) default if unknown."""
    try:
        return int(pltpu.get_tpu_info().vmem_capacity_bytes)
    except Exception:
        return 64 << 20


def _choose_tile_b(B, resident_weight_bytes, vmem_cap):
    """Batch-tile choice: fill the MXU but keep >=4 grid steps on big batches
    (>=2 steps per TensorCore on megacore parts) so DMA overlaps compute."""
    big_vmem = vmem_cap >= (100 << 20)               # v5e/v6e-class parts
    if big_vmem and B >= 4 * 512 and resident_weight_bytes <= (24 << 20):
        return 512                                   # amortize per-step overhead
    if B >= 4 * 256:
        return 256
    if B >= 4 * 128:
        return 128
    if B >= 32:
        return _round_up(pl.cdiv(B, 4), 8)           # ~4 steps, sublane aligned
    return _round_up(max(B, 8), 8)                   # tiny batch: single step


# ----------------------------------------------------------------------------
# Kernel
# ----------------------------------------------------------------------------
def _ae_kernel(x_ref, w1_ref, b1_ref, w2_ref, b2_ref, o_ref):
    """Fused encoder(Linear+ReLU) -> decoder(Linear+Sigmoid) on one batch tile.

    x_ref  : [TB, D]  VMEM (original input dtype; cast to matmul dtype here)
    w1_ref : [D, H]   VMEM (resident encoder weight, bf16)
    b1_ref : [1, H]   VMEM f32
    w2_ref : [H, D]   VMEM (resident decoder weight, bf16)
    b2_ref : [1, D]   VMEM f32
    o_ref  : [TB, D]  VMEM
    """
    # One VPU cast per tile (hidden under MXU/DMA) instead of a host-side pass.
    x = x_ref[...].astype(w1_ref.dtype)
    # Encoder: MXU matmul with f32 accumulation; bias + ReLU epilogue in f32.
    h = jnp.dot(x, w1_ref[...], preferred_element_type=jnp.float32)
    h = jnp.maximum(h + b1_ref[...], 0.0)
    # Decoder: cast activations to the weight dtype for the MXU, accumulate f32.
    y = jnp.dot(h.astype(w2_ref.dtype), w2_ref[...],
                preferred_element_type=jnp.float32)
    t = y + b2_ref[...]
    # Single-EUP sigmoid: sigmoid(t) = 0.5 * (tanh(0.5 * t) + 1).
    o_ref[...] = (0.5 * (jnp.tanh(0.5 * t) + 1.0)).astype(o_ref.dtype)
    # TODO(synk): for very large D/H (resident weights > ~1/3 VMEM), add a
    # column-tiled decoder / K-reduction grid axis instead of full residency.


# ----------------------------------------------------------------------------
# Parameter preparation (done ONCE, hoisted out of the per-forward path)
# ----------------------------------------------------------------------------
class AEParams(NamedTuple):
    w1: jax.Array          # [D_pad, H_pad] matmul dtype
    b1: jax.Array          # [1, H_pad]     f32
    w2: jax.Array          # [H_pad, D_pad] matmul dtype
    b2: jax.Array          # [1, D_pad]     f32
    d_in: int
    hidden: int


def prepare_ae_params(w1, b1, w2, b2, *, matmul_dtype=jnp.bfloat16):
    """Pad feature dims to multiples of 128 and cast weights once.

    w1: [D_in, H]  b1: [H]  w2: [H, D_in]  b2: [D_in]
    Zero padding is exact: padded hidden units give ReLU(0)=0 and padded W2
    rows/columns contribute nothing to the real output columns.
    """
    D_in, H = w1.shape
    assert w2.shape == (H, D_in) and b1.shape == (H,) and b2.shape == (D_in,)
    D_pad = _round_up(D_in, 128)
    H_pad = _round_up(H, 128)

    def _pad2(a, s0, s1):
        return jnp.pad(a, ((0, s0 - a.shape[0]), (0, s1 - a.shape[1])))

    w1_p = _pad2(w1, D_pad, H_pad).astype(matmul_dtype)
    w2_p = _pad2(w2, H_pad, D_pad).astype(matmul_dtype)
    b1_p = jnp.pad(b1, (0, H_pad - H)).astype(jnp.float32).reshape(1, H_pad)
    b2_p = jnp.pad(b2, (0, D_pad - D_in)).astype(jnp.float32).reshape(1, D_pad)
    return AEParams(w1_p, b1_p, w2_p, b2_p, D_in, H)


# ----------------------------------------------------------------------------
# Forward
# ----------------------------------------------------------------------------
_SINGLE_BUFFER_WEIGHTS = True   # flipped (once) if pl.Buffered(1) unsupported


def autoencoder_forward(x, params: AEParams, *, tile_b=None, out_dtype=None):
    """Fused autoencoder forward as a single Pallas TPU kernel.

    x : [B, D_in] (any float dtype).  Returns [B, D_in] in out_dtype (default
    x.dtype; pass jnp.bfloat16 to halve output HBM traffic if acceptable).
    """
    global _SINGLE_BUFFER_WEIGHTS

    B, D_in = x.shape
    assert D_in == params.d_in, "input dim mismatch with prepared params"
    D_pad, H_pad = params.w1.shape
    out_dtype = out_dtype if out_dtype is not None else x.dtype

    mm_size = jnp.dtype(params.w1.dtype).itemsize
    x_size = jnp.dtype(x.dtype).itemsize
    out_size = jnp.dtype(out_dtype).itemsize
    vmem_cap = _vmem_capacity_bytes()
    resident_weight_bytes = 2 * D_pad * H_pad * mm_size

    if tile_b is None:
        tile_b = _choose_tile_b(B, resident_weight_bytes, vmem_cap)
    B_pad = _round_up(B, tile_b)

    # Pad x only when the shape actually requires it (no gratuitous HBM pass).
    if B_pad != B or D_pad != D_in:
        x_in = jnp.pad(x, ((0, B_pad - B), (0, D_pad - D_in)))
    else:
        x_in = x

    grid = (B_pad // tile_b,)

    def _build(single_buffer_weights):
        def _resident_spec(shape):
            if single_buffer_weights:
                return pl.BlockSpec(shape, lambda i: (0, 0),
                                    pipeline_mode=pl.Buffered(1))
            return pl.BlockSpec(shape, lambda i: (0, 0))

        in_specs = [
            pl.BlockSpec((tile_b, D_pad), lambda i: (i, 0)),   # x tile (pipelined)
            _resident_spec((D_pad, H_pad)),                    # W1 (resident)
            _resident_spec((1, H_pad)),                        # b1
            _resident_spec((H_pad, D_pad)),                    # W2 (resident)
            _resident_spec((1, D_pad)),                        # b2
        ]
        out_specs = pl.BlockSpec((tile_b, D_pad), lambda i: (i, 0))

        nbuf_w = 1 if single_buffer_weights else 2
        vmem_bytes = (
            2 * tile_b * D_pad * x_size                  # x tiles (double-buffered)
            + 2 * tile_b * D_pad * out_size              # out tiles
            + nbuf_w * resident_weight_bytes             # W1 + W2
            + nbuf_w * (H_pad + D_pad) * 4               # biases
            + tile_b * (H_pad + 2 * D_pad) * 4           # f32 intermediates h / y
            + tile_b * D_pad * mm_size                   # in-kernel bf16 x cast
        )
        # Per-generation budget: ~50 MiB on 64 MiB v7x, ~100 MiB on 128 MiB parts.
        vmem_budget = int(vmem_cap * 0.78)
        vmem_limit = int(min(vmem_bytes * 1.5 + (8 << 20), vmem_budget))

        cost = pl.CostEstimate(
            flops=4 * B_pad * D_pad * H_pad,             # two matmuls
            transcendentals=B_pad * D_pad,               # tanh (sigmoid)
            bytes_accessed=B_pad * D_pad * (x_size + out_size)
            + resident_weight_bytes + (H_pad + D_pad) * 4,
        )

        return pl.pallas_call(
            _ae_kernel,
            out_shape=jax.ShapeDtypeStruct((B_pad, D_pad), out_dtype),
            grid_spec=pl.GridSpec(grid=grid, in_specs=in_specs,
                                  out_specs=out_specs),
            compiler_params=pltpu.CompilerParams(
                dimension_semantics=("parallel",),
                vmem_limit_bytes=vmem_limit),
            cost_estimate=cost,
        )

    if _SINGLE_BUFFER_WEIGHTS:
        try:
            out_p = _build(True)(x_in, params.w1, params.b1, params.w2, params.b2)
        except Exception:
            # Installed JAX/Mosaic rejected pl.Buffered(1) resident specs; fall
            # back to default buffering from now on (decided once, cached).
            _SINGLE_BUFFER_WEIGHTS = False
            out_p = _build(False)(x_in, params.w1, params.b1, params.w2, params.b2)
    else:
        out_p = _build(False)(x_in, params.w1, params.b1, params.w2, params.b2)

    # Avoid the post-kernel slice (an extra HBM pass) when already aligned.
    if B_pad == B and D_pad == D_in:
        return out_p
    return out_p[:B, :D_in]


# ----------------------------------------------------------------------------
# Reference + demo
# ----------------------------------------------------------------------------
def _torch_linear_init(key, fan_in, fan_out, dtype=jnp.float32):
    """nn.Linear-style init: U(-1/sqrt(fan_in), 1/sqrt(fan_in)).

    Returns W of shape [fan_in, fan_out] (transposed for x @ W) and b [fan_out].
    """
    kw, kb = jax.random.split(key)
    bound = 1.0 / jnp.sqrt(fan_in)
    w = jax.random.uniform(kw, (fan_in, fan_out), dtype, -bound, bound)
    b = jax.random.uniform(kb, (fan_out,), dtype, -bound, bound)
    return w, b


def _reference_forward(x, w1, b1, w2, b2):
    h = jnp.maximum(x @ w1 + b1, 0.0)
    return jax.nn.sigmoid(h @ w2 + b2)


if __name__ == "__main__":
    # Small, deterministic shapes consistent with an MLP autoencoder forward.
    B, D_IN, HIDDEN = 8, 64, 32

    key = jax.random.PRNGKey(0)
    kx, k_enc, k_dec = jax.random.split(key, 3)

    x = jax.random.normal(kx, (B, D_IN), jnp.float32)
    w1, b1 = _torch_linear_init(k_enc, D_IN, HIDDEN)   # encoder Linear
    w2, b2 = _torch_linear_init(k_dec, HIDDEN, D_IN)   # decoder Linear

    params = prepare_ae_params(w1, b1, w2, b2)         # pad + cast once
    out = autoencoder_forward(x, params)
    out = jax.block_until_ready(out)

    ref = _reference_forward(x, w1, b1, w2, b2)
    assert out.shape == (B, D_IN) and out.dtype == x.dtype
    # bf16 matmul operands vs f32 reference -> loose-ish tolerance (sigmoid
    # output lies in [0,1]; observed error << 1e-2).
    assert jnp.allclose(out, ref, atol=2e-2, rtol=2e-2), "mismatch vs JAX reference"

    print("KERNEL_OK")
</pallas_src>

<mosaic_0001>
module attributes {stable_mosaic.version = 11 : i64} {
  func.func @_ae_kernel(%arg0: i32, %arg1: memref<8x128xf32, #tpu.memory_space<vmem>>, %arg2: memref<128x128xbf16, #tpu.memory_space<vmem>>, %arg3: memref<1x128xf32, #tpu.memory_space<vmem>>, %arg4: memref<128x128xbf16, #tpu.memory_space<vmem>>, %arg5: memref<1x128xf32, #tpu.memory_space<vmem>>, %arg6: memref<8x128xf32, #tpu.memory_space<vmem>>) attributes {dimension_semantics = [#tpu.dimension_semantics<parallel>], iteration_bounds = array<i64: 1>, scalar_prefetch = 0 : i64, scratch_operands = 0 : i64, tpu.core_type = #tpu.core_type<tc>, window_params = [{transform_indices = @transform_0, window_bounds = array<i64: 8, 128>}, {pipeline_mode = #tpu.pipeline_mode<synchronous>, transform_indices = @transform_1, window_bounds = array<i64: 128, 128>}, {pipeline_mode = #tpu.pipeline_mode<synchronous>, transform_indices = @transform_2, window_bounds = array<i64: 1, 128>}, {pipeline_mode = #tpu.pipeline_mode<synchronous>, transform_indices = @transform_3, window_bounds = array<i64: 128, 128>}, {pipeline_mode = #tpu.pipeline_mode<synchronous>, transform_indices = @transform_4, window_bounds = array<i64: 1, 128>}, {transform_indices = @transform_5, window_bounds = array<i64: 8, 128>}]} {
    %c0 = arith.constant 0 : index
    %c0_0 = arith.constant 0 : index
    %0 = vector.load %arg1[%c0, %c0_0] : memref<8x128xf32, #tpu.memory_space<vmem>>, vector<8x128xf32>
    %1 = arith.truncf %0 : vector<8x128xf32> to vector<8x128xbf16>
    %c0_1 = arith.constant 0 : index
    %c0_2 = arith.constant 0 : index
    %2 = vector.load %arg2[%c0_1, %c0_2] : memref<128x128xbf16, #tpu.memory_space<vmem>>, vector<128x128xbf16>
    %cst = arith.constant dense<0.000000e+00> : vector<8x128xf32>
    %3 = tpu.matmul %1, %2, %cst {dimension_numbers = #tpu.dot_dimension_numbers<[1], [0], [0], [1], [0, 0, 1, 1], [], []>} : vector<8x128xbf16>, vector<128x128xbf16>, vector<8x128xf32> -> vector<8x128xf32>
    %c0_3 = arith.constant 0 : index
    %c0_4 = arith.constant 0 : index
    %4 = vector.load %arg3[%c0_3, %c0_4] : memref<1x128xf32, #tpu.memory_space<vmem>>, vector<1x128xf32>
    %5 = vector.broadcast %4 : vector<1x128xf32> to vector<8x128xf32>
    %6 = arith.addf %3, %5 : vector<8x128xf32>
    %cst_5 = arith.constant 0.000000e+00 : f32
    %7 = vector.broadcast %cst_5 : f32 to vector<8x128xf32>
    %8 = arith.maximumf %6, %7 : vector<8x128xf32>
    %9 = arith.truncf %8 : vector<8x128xf32> to vector<8x128xbf16>
    %c0_6 = arith.constant 0 : index
    %c0_7 = arith.constant 0 : index
    %10 = vector.load %arg4[%c0_6, %c0_7] : memref<128x128xbf16, #tpu.memory_space<vmem>>, vector<128x128xbf16>
    %cst_8 = arith.constant dense<0.000000e+00> : vector<8x128xf32>
    %11 = tpu.matmul %9, %10, %cst_8 {dimension_numbers = #tpu.dot_dimension_numbers<[1], [0], [0], [1], [0, 0, 1, 1], [], []>} : vector<8x128xbf16>, vector<128x128xbf16>, vector<8x128xf32> -> vector<8x128xf32>
    %c0_9 = arith.constant 0 : index
    %c0_10 = arith.constant 0 : index
    %12 = vector.load %arg5[%c0_9, %c0_10] : memref<1x128xf32, #tpu.memory_space<vmem>>, vector<1x128xf32>
    %13 = vector.broadcast %12 : vector<1x128xf32> to vector<8x128xf32>
    %14 = arith.addf %11, %13 : vector<8x128xf32>
    %cst_11 = arith.constant 5.000000e-01 : f32
    %15 = vector.broadcast %cst_11 : f32 to vector<8x128xf32>
    %16 = arith.mulf %15, %14 : vector<8x128xf32>
    %17 = math.tanh %16 : vector<8x128xf32>
    %cst_12 = arith.constant 1.000000e+00 : f32
    %18 = vector.broadcast %cst_12 : f32 to vector<8x128xf32>
    %19 = arith.addf %17, %18 : vector<8x128xf32>
    %cst_13 = arith.constant 5.000000e-01 : f32
    %20 = vector.broadcast %cst_13 : f32 to vector<8x128xf32>
    %21 = arith.mulf %20, %19 : vector<8x128xf32>
    %c0_14 = arith.constant 0 : index
    %c0_15 = arith.constant 0 : index
    %22 = vector.load %arg6[%c0_14, %c0_15] : memref<8x128xf32, #tpu.memory_space<vmem>>, vector<8x128xf32>
    tpu.vector_store %arg6[%c0_14, %c0_15], %21 {strides = array<i32>} : memref<8x128xf32, #tpu.memory_space<vmem>>, vector<8x128xf32>,
    return
  }
  func.func @transform_0(%arg0: i32) -> (i32, i32) {
    %c0_i32 = arith.constant 0 : i32
    %c0_i32_0 = arith.constant 0 : i32
    return %arg0, %c0_i32 : i32, i32
  }
  func.func @transform_1(%arg0: i32) -> (i32, i32) {
    %c0_i32 = arith.constant 0 : i32
    %c0_i32_0 = arith.constant 0 : i32
    %c0_i32_1 = arith.constant 0 : i32
    return %c0_i32, %c0_i32_0 : i32, i32
  }
  func.func @transform_2(%arg0: i32) -> (i32, i32) {
    %c0_i32 = arith.constant 0 : i32
    %c0_i32_0 = arith.constant 0 : i32
    %c0_i32_1 = arith.constant 0 : i32
    return %c0_i32, %c0_i32_0 : i32, i32
  }
  func.func @transform_3(%arg0: i32) -> (i32, i32) {
    %c0_i32 = arith.constant 0 : i32
    %c0_i32_0 = arith.constant 0 : i32
    %c0_i32_1 = arith.constant 0 : i32
    return %c0_i32, %c0_i32_0 : i32, i32
  }
  func.func @transform_4(%arg0: i32) -> (i32, i32) {
    %c0_i32 = arith.constant 0 : i32
    %c0_i32_0 = arith.constant 0 : i32
    %c0_i32_1 = arith.constant 0 : i32
    return %c0_i32, %c0_i32_0 : i32, i32
  }
  func.func @transform_5(%arg0: i32) -> (i32, i32) {
    %c0_i32 = arith.constant 0 : i32
    %c0_i32_0 = arith.constant 0 : i32
    return %arg0, %c0_i32 : i32, i32
  }
}

module attributes {stable_mosaic.version = 11 : i64} {
  func.func @_ae_kernel(%arg0: i32, %arg1: memref<8x128xf32, #tpu.memory_space<vmem>>, %arg2: memref<128x128xbf16, #tpu.memory_space<vmem>>, %arg3: memref<1x128xf32, #tpu.memory_space<vmem>>, %arg4: memref<128x128xbf16, #tpu.memory_space<vmem>>, %arg5: memref<1x128xf32, #tpu.memory_space<vmem>>, %arg6: memref<8x128xf32, #tpu.memory_space<vmem>>) attributes {dimension_semantics = [#tpu.dimension_semantics<parallel>], iteration_bounds = array<i64: 1>, scalar_prefetch = 0 : i64, scratch_operands = 0 : i64, tpu.core_type = #tpu.core_type<tc>, window_params = [{transform_indices = @transform_0, window_bounds = array<i64: 8, 128>}, {pipeline_mode = #tpu.pipeline_mode<synchronous>, transform_indices = @transform_1, window_bounds = array<i64: 128, 128>}, {pipeline_mode = #tpu.pipeline_mode<synchronous>, transform_indices = @transform_2, window_bounds = array<i64: 1, 128>}, {pipeline_mode = #tpu.pipeline_mode<synchronous>, transform_indices = @transform_3, window_bounds = array<i64: 128, 128>}, {pipeline_mode = #tpu.pipeline_mode<synchronous>, transform_indices = @transform_4, window_bounds = array<i64: 1, 128>}, {transform_indices = @transform_5, window_bounds = array<i64: 8, 128>}]} {
    %c0 = arith.constant 0 : index
    %c0_0 = arith.constant 0 : index
    %0 = vector.load %arg1[%c0, %c0_0] : memref<8x128xf32, #tpu.memory_space<vmem>>, vector<8x128xf32>
    %1 = arith.truncf %0 : vector<8x128xf32> to vector<8x128xbf16>
    %c0_1 = arith.constant 0 : index
    %c0_2 = arith.constant 0 : index
    %2 = vector.load %arg2[%c0_1, %c0_2] : memref<128x128xbf16, #tpu.memory_space<vmem>>, vector<128x128xbf16>
    %cst = arith.constant dense<0.000000e+00> : vector<8x128xf32>
    %3 = tpu.matmul %1, %2, %cst {dimension_numbers = #tpu.dot_dimension_numbers<[1], [0], [0], [1], [0, 0, 1, 1], [], []>} : vector<8x128xbf16>, vector<128x128xbf16>, vector<8x128xf32> -> vector<8x128xf32>
    %c0_3 = arith.constant 0 : index
    %c0_4 = arith.constant 0 : index
    %4 = vector.load %arg3[%c0_3, %c0_4] : memref<1x128xf32, #tpu.memory_space<vmem>>, vector<1x128xf32>
    %5 = vector.broadcast %4 : vector<1x128xf32> to vector<8x128xf32>
    %6 = arith.addf %3, %5 : vector<8x128xf32>
    %cst_5 = arith.constant 0.000000e+00 : f32
    %7 = vector.broadcast %cst_5 : f32 to vector<8x128xf32>
    %8 = arith.maximumf %6, %7 : vector<8x128xf32>
    %9 = arith.truncf %8 : vector<8x128xf32> to vector<8x128xbf16>
    %c0_6 = arith.constant 0 : index
    %c0_7 = arith.constant 0 : index
    %10 = vector.load %arg4[%c0_6, %c0_7] : memref<128x128xbf16, #tpu.memory_space<vmem>>, vector<128x128xbf16>
    %cst_8 = arith.constant dense<0.000000e+00> : vector<8x128xf32>
    %11 = tpu.matmul %9, %10, %cst_8 {dimension_numbers = #tpu.dot_dimension_numbers<[1], [0], [0], [1], [0, 0, 1, 1], [], []>} : vector<8x128xbf16>, vector<128x128xbf16>, vector<8x128xf32> -> vector<8x128xf32>
    %c0_9 = arith.constant 0 : index
    %c0_10 = arith.constant 0 : index
    %12 = vector.load %arg5[%c0_9, %c0_10] : memref<1x128xf32, #tpu.memory_space<vmem>>, vector<1x128xf32>
    %13 = vector.broadcast %12 : vector<1x128xf32> to vector<8x128xf32>
    %14 = arith.addf %11, %13 : vector<8x128xf32>
    %cst_11 = arith.constant 5.000000e-01 : f32
    %15 = vector.broadcast %cst_11 : f32 to vector<8x128xf32>
    %16 = arith.mulf %15, %14 : vector<8x128xf32>
    %17 = math.tanh %16 : vector<8x128xf32>
    %cst_12 = arith.constant 1.000000e+00 : f32
    %18 = vector.broadcast %cst_12 : f32 to vector<8x128xf32>
    %19 = arith.addf %17, %18 : vector<8x128xf32>
    %cst_13 = arith.constant 5.000000e-01 : f32
    %20 = vector.broadcast %cst_13 : f32 to vector<8x128xf32>
    %21 = arith.mulf %20, %19 : vector<8x128xf32>
    %c0_14 = arith.constant 0 : index
    %c0_15 = arith.constant 0 : index
    %22 = vector.load %arg6[%c0_14, %c0_15] : memref<8x128xf32, #tpu.memory_space<vmem>>, vector<8x128xf32>
    tpu.vector_store %arg6[%c0_14, %c0_15], %21 {strides = array<i32>} : memref<8x128xf32, #tpu.memory_space<vmem>>, vector<8x128xf32>,
    return
  }
  func.func @transform_0(%arg0: i32) -> (i32, i32) {
    %c0_i32 = arith.constant 0 : i32
    %c0_i32_0 = arith.constant 0 : i32
    return %arg0, %c0_i32 : i32, i32
  }
  func.func @transform_1(%arg0: i32) -> (i32, i32) {
    %c0_i32 = arith.constant 0 : i32
    %c0_i32_0 = arith.constant 0 : i32
    %c0_i32_1 = arith.constant 0 : i32
    return %c0_i32, %c0_i32_0 : i32, i32
  }
  func.func @transform_2(%arg0: i32) -> (i32, i32) {
    %c0_i32 = arith.constant 0 : i32
    %c0_i32_0 = arith.constant 0 : i32
    %c0_i32_1 = arith.constant 0 : i32
    return %c0_i32, %c0_i32_0 : i32, i32
  }
  func.func @transform_3(%arg0: i32) -> (i32, i32) {
    %c0_i32 = arith.constant 0 : i32
    %c0_i32_0 = arith.constant 0 : i32
    %c0_i32_1 = arith.constant 0 : i32
    return %c0_i32, %c0_i32_0 : i32, i32
  }
  func.func @transform_4(%arg0: i32) -> (i32, i32) {
    %c0_i32 = arith.constant 0 : i32
    %c0_i32_0 = arith.constant 0 : i32
    %c0_i32_1 = arith.constant 0 : i32
    return %c0_i32, %c0_i32_0 : i32, i32
  }
  func.func @transform_5(%arg0: i32) -> (i32, i32) {
    %c0_i32 = arith.constant 0 : i32
    %c0_i32_0 = arith.constant 0 : i32
    return %arg0, %c0_i32 : i32, i32
  }
}

</mosaic_0001>

<bundles_post_ra>
// kernel: tpu_custom_call.1
= control target key start
LH: loop header
LB: loop body
LE: loop exit
PB: predicated region body
PF: predicated region fallthrough
CT: control target
= control target key end

     0   :  { %10 = vsyncpa [#allocation3], 0  ;;  %s602_s0 = inlined_call_operand.hbm [shape: f32[8,128], index: 0, kind: input, shape index: {}]   ;;  %s603_s1 = inlined_call_operand.hbm [shape: bf16[128,128], index: 1, kind: input, shape index: {}]   ;;  %s604_s2 = inlined_call_operand.vmem [shape: f32[1,128], index: 2, kind: input, shape index: {}]   ;;  %s605_s3 = inlined_call_operand.hbm [shape: bf16[128,128], index: 3, kind: input, shape index: {}]   ;;  %s606_s4 = inlined_call_operand.vmem [shape: f32[1,128], index: 4, kind: input, shape index: {}]   ;;  %s607_s5 = inlined_call_operand.hbm [shape: f32[8,128], index: 5, kind: output, shape index: {}]  }
   0x1   :  { %11 = vsyncpa [#allocation6], 0 }
   0x2   :  { %12 = vsyncpa [#allocation4], 0  ;;  %s504_s18 = smov [#allocation5]   ;;  %s410_s22 = scalar_lea.hbm %s603_s1, 1024 }
   0x3   :  { %s28_s19 = sshll.u32 %s504_s18, 4  ;;  %p411_p0 = scmp.ne.s32.totalorder %s603_s1, %s410_s22  ;;  %s29_s19 = int_to_ptr.vmem [resolvable:$true] %s28_s19 }
   0x4   :  { %p414_p1 = scmp.lt.u32.totalorder %s410_s22, %s603_s1 }
   0x6   :  { %p416_p2 = pnand %p414_p1, %p411_p0 }
   0x8   :  { %419 = shalt.err (!%p416_p2)
}
   0x9   :  { %s420_s27 = scalar_lea.vmem %s29_s19, 1024  ;;  %p425_p4 = scmp.lt.s32.totalorder %s29_s19, %s29_s19 }
   0xa   :  { %p421_p3 = scmp.ne.s32.totalorder %s29_s19, %s420_s27  ;;  %p426_p5 = scmp.lt.s32.totalorder %s420_s27, %s420_s27 }
   0xc   :  { %p427_p6 = por %p426_p5, %p425_p4 }
   0xe   :  { %p428_p7 = pnand %p427_p6, %p421_p3 }
  0x10   :  { %431 = shalt.err (!%p428_p7)
}
  0x11   :  { %s505_s28 = smov 64   ;;  %s506_s29 = smov 4  }
  0x12   :  { %34 = dma.hbm_to_vmem [thread:$0]  %s603_s1, 1024, %s29_s19, [#allocation6], %s505_s28, %s505_s28, %s506_s29  }
  0x13   :  { %s507_s7 = smov [#allocation2]   ;;  %s508_s9 = smov [#allocation7]  }
  0x14   :  { %s19_s8 = sshll.u32 %s507_s7, 4  ;;  %s42_s10 = sshll.u32 %s508_s9, 4  ;;  %s20_s8 = int_to_ptr.vmem [resolvable:$true] %s19_s8  ;;  %s43_s10 = int_to_ptr.vmem [resolvable:$true] %s42_s10 }
  0x15   :  { %s432_s13 = scalar_lea.hbm %s602_s0, 128 }
  0x16   :  { %p433_p8 = scmp.ne.s32.totalorder %s602_s0, %s432_s13  ;;  %p436_p9 = scmp.lt.u32.totalorder %s432_s13, %s602_s0 }
  0x18   :  { %p438_p10 = pnand %p436_p9, %p433_p8 }
  0x1a   :  { %441 = shalt.err (!%p438_p10)
}
  0x1b   :  { %s442_s1 = scalar_lea.vmem %s20_s8, 128  ;;  %p447_p12 = scmp.lt.s32.totalorder %s20_s8, %s20_s8 }
  0x1c   :  { %p443_p11 = scmp.ne.s32.totalorder %s20_s8, %s442_s1  ;;  %p448_p13 = scmp.lt.s32.totalorder %s442_s1, %s442_s1 }
  0x1e   :  { %p449_p0 = por %p448_p13, %p447_p12 }
  0x20   :  { %p450_p1 = pnand %p449_p0, %p443_p11 }
  0x22   :  { %453 = shalt.err (!%p450_p1)
}
  0x23   :  { %22 = dma.hbm_to_vmem [thread:$0]  %s602_s0, 128, %s20_s8, [#allocation3]  }
  0x24   :  { %s454_s22 = scalar_lea.hbm %s605_s3, 1024 }
  0x25   :  { %p455_p2 = scmp.ne.s32.totalorder %s605_s3, %s454_s22  ;;  %p458_p3 = scmp.lt.u32.totalorder %s454_s22, %s605_s3 }
  0x27   :  { %p460_p4 = pnand %p458_p3, %p455_p2 }
  0x29   :  { %463 = shalt.err (!%p460_p4)
}
  0x2a   :  { %s464_s27 = scalar_lea.vmem %s43_s10, 1024  ;;  %p469_p6 = scmp.lt.s32.totalorder %s43_s10, %s43_s10 }
  0x2b   :  { %p465_p5 = scmp.ne.s32.totalorder %s43_s10, %s464_s27  ;;  %p470_p7 = scmp.lt.s32.totalorder %s464_s27, %s464_s27 }
  0x2d   :  { %p471_p8 = por %p470_p7, %p469_p6 }
  0x2f   :  { %p472_p9 = pnand %p471_p8, %p465_p5 }
  0x31   :  { %475 = shalt.err (!%p472_p9)
}
  0x32   :  { %48 = dma.hbm_to_vmem [thread:$0]  %s605_s3, 1024, %s43_s10, [#allocation6], %s505_s28, %s505_s28, %s506_s29  }
  0x33   :  { %498 = dma.done.wait [#allocation3], 128  }
  0x34   :  { %499 = vsyncadd [#allocation3], 4294967168 }
  0x35   :  { %500 = dma.done.wait [#allocation6], 2048  }
  0x36   :  { %501 = vsyncadd [#allocation6], 4294965248  ;;  %v509_v0 = vmov 0.0   ;;  %vm510_vm0 = vmmov 0   ;;  %v392_v1 = vld [vmem:[#allocation5] sm:$0xff]   ;;  %v393_v2 = vld [vmem:[#allocation5 + $0x8] sm:$0xff]  }
  0x37   :  { %344 = vmatprep.subr.bf16.mxu0 %v509_v0  ;;  %360 = vmatprep.mubr.msk.bf16.mxu0 %vm510_vm0, %v509_v0  ;;  %v394_v3 = vld [vmem:[#allocation5 + $0x10] sm:$0xff]   ;;  %v400_v4 = vld [vmem:[#allocation7] sm:$0xff]   ;;  %v395_v5 = vld [vmem:[#allocation5 + $0x18] sm:$0xff]  }
  0x38   :  { %364 = vmatprep.subr.bf16.mxu1 %v509_v0  ;;  %380 = vmatprep.mubr.msk.bf16.mxu1 %vm510_vm0, %v509_v0  ;;  %v401_v6 = vld [vmem:[#allocation7 + $0x8] sm:$0xff]   ;;  %v396_v7 = vld [vmem:[#allocation5 + $0x20] sm:$0xff]   ;;  %v402_v8 = vld [vmem:[#allocation7 + $0x10] sm:$0xff]  }
  0x39   :  { %345 = vmatpush3.bf16.msra.mxu0 %v392_v1  ;;  %365 = vmatpush3.bf16.msra.mxu1 %v400_v4  ;;  %v397_v9 = vld [vmem:[#allocation5 + $0x28] sm:$0xff]   ;;  %v403_v10 = vld [vmem:[#allocation7 + $0x18] sm:$0xff]   ;;  %v398_v11 = vld [vmem:[#allocation5 + $0x30] sm:$0xff]  }
  0x3a   :  { %346 = vmatprep.subr.bf16.mxu0 %v509_v0  ;;  %366 = vmatprep.subr.bf16.mxu1 %v509_v0  ;;  %v404_v12 = vld [vmem:[#allocation7 + $0x20] sm:$0xff]   ;;  %v399_v13 = vld [vmem:[#allocation5 + $0x38] sm:$0xff]   ;;  %v405_v15 = vld [vmem:[#allocation7 + $0x28] sm:$0xff]  }
  0x3b   :  { %v61_v14 = vld [vmem:[#allocation2] sm:$0xff]  ;;  %v406_v17 = vld [vmem:[#allocation7 + $0x30] sm:$0xff]  }
  0x3c   :  { %v62_v16 = vpack.c.bf16 %v61_v14, %v61_v14  ;;  %v407_v18 = vld [vmem:[#allocation7 + $0x38] sm:$0xff]  }
  0x3d   :  { %347 = vmatpush3.bf16.msra.mxu0 %v393_v2  ;;  %367 = vmatpush3.bf16.msra.mxu1 %v401_v6  ;;  %v308_v19 = vld [vmem:[%s604_s2] ss:$0 sm:$0xff]  ;;  %s511_s2 = smov [#allocation8]  }
  0x3e   :  { %348 = vmatprep.subr.bf16.mxu0 %v509_v0  ;;  %368 = vmatprep.subr.bf16.mxu1 %v509_v0  ;;  %v317_v27 = vld [vmem:[%s606_s4] ss:$0 sm:$0xff]  ;;  %s298_s7 = sshll.u32 %s511_s2, 4  ;;  %s299_s7 = int_to_ptr.vmem [resolvable:$true] %s298_s7 }
  0x3f   :  { %s476_s8 = scalar_lea.vmem %s299_s7, 128  ;;  %p481_p11 = scmp.lt.s32.totalorder %s299_s7, %s299_s7 }
  0x40   :  { %p477_p10 = scmp.ne.s32.totalorder %s299_s7, %s476_s8  ;;  %p482_p12 = scmp.lt.s32.totalorder %s476_s8, %s476_s8 }
  0x41   :  { %349 = vmatpush3.bf16.msra.mxu0 %v394_v3  ;;  %369 = vmatpush3.bf16.msra.mxu1 %v402_v8 }
  0x42   :  { %350 = vmatprep.subr.bf16.mxu0 %v509_v0  ;;  %370 = vmatprep.subr.bf16.mxu1 %v509_v0  ;;  %p483_p13 = por %p482_p12, %p481_p11 }
  0x44   :  { %p484_p0 = pnand %p483_p13, %p477_p10 }
  0x45   :  { %351 = vmatpush3.bf16.msra.mxu0 %v395_v5  ;;  %371 = vmatpush3.bf16.msra.mxu1 %v403_v10 }
  0x46   :  { %352 = vmatprep.subr.bf16.mxu0 %v509_v0  ;;  %372 = vmatprep.subr.bf16.mxu1 %v509_v0 }
  0x49   :  { %353 = vmatpush3.bf16.msra.mxu0 %v396_v7  ;;  %373 = vmatpush3.bf16.msra.mxu1 %v404_v12 }
  0x4a   :  { %354 = vmatprep.subr.bf16.mxu0 %v509_v0  ;;  %374 = vmatprep.subr.bf16.mxu1 %v509_v0 }
  0x4d   :  { %355 = vmatpush3.bf16.msra.mxu0 %v397_v9  ;;  %375 = vmatpush3.bf16.msra.mxu1 %v405_v15 }
  0x4e   :  { %356 = vmatprep.subr.bf16.mxu0 %v509_v0  ;;  %376 = vmatprep.subr.bf16.mxu1 %v509_v0 }
  0x51   :  { %357 = vmatpush3.bf16.msra.mxu0 %v398_v11  ;;  %377 = vmatpush3.bf16.msra.mxu1 %v406_v17 }
  0x52   :  { %358 = vmatprep.subr.bf16.mxu0 %v509_v0  ;;  %378 = vmatprep.subr.bf16.mxu1 %v509_v0 }
  0x55   :  { %359 = vmatpush3.bf16.msra.mxu0 %v399_v13  ;;  %379 = vmatpush3.bf16.msra.mxu1 %v407_v18 }
  0x58   :  { %361 = vmatmul.mubr.bf16.vlgmr.msra.gmra.mrb[0].mxu0 %v62_v16 }
 0x12b   :  { %v168_v20 = vpop.f32.mrb[0].mxu0 }
 0x12c   :  { %v169_v21 = vadd.f32 %v308_v19, %v168_v20  ;;  %v362_v22 = vpop.f32.mrb[1].mxu0 }
 0x12d   :  { %v171_v23 = vpop.f32.mrb[2].mxu0 }
 0x12e   :  { %v174_v24 = vmax.f32 %v169_v21, 0.0  ;;  %v363_v25 = vpop.f32.mrb[3].mxu0 }
 0x130   :  { %v175_v26 = vpack.c.bf16 %v174_v24, %v174_v24 }
 0x132   :  { %381 = vmatmul.mubr.bf16.vlgmr.msra.gmra.mrb[0].mxu1 %v175_v26 }
 0x205   :  { %v281_v28 = vpop.f32.mrb[0].mxu1 }
 0x206   :  { %v282_v29 = vadd.f32 %v317_v27, %v281_v28  ;;  %v382_v30 = vpop.f32.mrb[1].mxu1 }
 0x207   :  { %v284_v31 = vpop.f32.mrb[2].mxu1 }
 0x208   :  { %v287_v32 = vmul.f32 0.5, %v282_v29  ;;  %v383_v33 = vpop.f32.mrb[3].mxu1 }
 0x20a   :  { %408 = vtanh.f32 %v287_v32 }
 0x214   :  { %v409_v34 = vpop.eup %408 }
 0x215   :  { %v289_v35 = vadd.f32 1.0, %v409_v34 }
 0x217   :  { %v290_v36 = vmul.f32 0.5, %v289_v35 }
 0x219   :  { %291 = vst [vmem:[#allocation8] sm:$0xff] %v290_v36 }
 0x21a   :  { %487 = shalt.err (!%p484_p0)
}
 0x21b   :  { %s488_s10 = scalar_lea.hbm %s607_s5, 128 }
 0x21c   :  { %p489_p1 = scmp.ne.s32.totalorder %s607_s5, %s488_s10  ;;  %p492_p2 = scmp.lt.u32.totalorder %s488_s10, %s607_s5 }
 0x21e   :  { %p494_p3 = pnand %p492_p2, %p489_p1 }
 0x220   :  { %497 = shalt.err (!%p494_p3)
}
 0x221   :  { %301 = dma.vmem_to_hbm [thread:$0]  %s299_s7, 128, %s607_s5, [#allocation4]  }
 0x222   :  { %502 = dma.done.wait [#allocation4], 128  }
 0x223   :  { %503 = vsyncadd [#allocation4], 4294967168 }
 0x224   :  { %305 = vsyncpa [#allocation3], 1 }
 0x225   :  { %306 = vsyncpa [#allocation6], 1 }
 0x226   :  { %307 = vsyncpa [#allocation4], 1 }

// kernel: tpu_custom_call.1
= control target key start
LH: loop header
LB: loop body
LE: loop exit
PB: predicated region body
PF: predicated region fallthrough
CT: control target
= control target key end

     0   :  { %10 = vsyncpa [#allocation3], 0  ;;  %s602_s0 = inlined_call_operand.hbm [shape: f32[8,128], index: 0, kind: input, shape index: {}]   ;;  %s603_s1 = inlined_call_operand.hbm [shape: bf16[128,128], index: 1, kind: input, shape index: {}]   ;;  %s604_s2 = inlined_call_operand.vmem [shape: f32[1,128], index: 2, kind: input, shape index: {}]   ;;  %s605_s3 = inlined_call_operand.hbm [shape: bf16[128,128], index: 3, kind: input, shape index: {}]   ;;  %s606_s4 = inlined_call_operand.vmem [shape: f32[1,128], index: 4, kind: input, shape index: {}]   ;;  %s607_s5 = inlined_call_operand.hbm [shape: f32[8,128], index: 5, kind: output, shape index: {}]  }
   0x1   :  { %11 = vsyncpa [#allocation6], 0 }
   0x2   :  { %12 = vsyncpa [#allocation4], 0  ;;  %s504_s18 = smov [#allocation5]   ;;  %s410_s22 = scalar_lea.hbm %s603_s1, 1024 }
   0x3   :  { %s28_s19 = sshll.u32 %s504_s18, 4  ;;  %p411_p0 = scmp.ne.s32.totalorder %s603_s1, %s410_s22  ;;  %s29_s19 = int_to_ptr.vmem [resolvable:$true] %s28_s19 }
   0x4   :  { %p414_p1 = scmp.lt.u32.totalorder %s410_s22, %s603_s1 }
   0x6   :  { %p416_p2 = pnand %p414_p1, %p411_p0 }
   0x8   :  { %419 = shalt.err (!%p416_p2)
}
   0x9   :  { %s420_s27 = scalar_lea.vmem %s29_s19, 1024  ;;  %p425_p4 = scmp.lt.s32.totalorder %s29_s19, %s29_s19 }
   0xa   :  { %p421_p3 = scmp.ne.s32.totalorder %s29_s19, %s420_s27  ;;  %p426_p5 = scmp.lt.s32.totalorder %s420_s27, %s420_s27 }
   0xc   :  { %p427_p6 = por %p426_p5, %p425_p4 }
   0xe   :  { %p428_p7 = pnand %p427_p6, %p421_p3 }
  0x10   :  { %431 = shalt.err (!%p428_p7)
}
  0x11   :  { %s505_s28 = smov 64   ;;  %s506_s29 = smov 4  }
  0x12   :  { %34 = dma.hbm_to_vmem [thread:$0]  %s603_s1, 1024, %s29_s19, [#allocation6], %s505_s28, %s505_s28, %s506_s29  }
  0x13   :  { %s507_s7 = smov [#allocation2]   ;;  %s508_s9 = smov [#allocation7]  }
  0x14   :  { %s19_s8 = sshll.u32 %s507_s7, 4  ;;  %s42_s10 = sshll.u32 %s508_s9, 4  ;;  %s20_s8 = int_to_ptr.vmem [resolvable:$true] %s19_s8  ;;  %s43_s10 = int_to_ptr.vmem [resolvable:$true] %s42_s10 }
  0x15   :  { %s432_s13 = scalar_lea.hbm %s602_s0, 128 }
  0x16   :  { %p433_p8 = scmp.ne.s32.totalorder %s602_s0, %s432_s13  ;;  %p436_p9 = scmp.lt.u32.totalorder %s432_s13, %s602_s0 }
  0x18   :  { %p438_p10 = pnand %p436_p9, %p433_p8 }
  0x1a   :  { %441 = shalt.err (!%p438_p10)
}
  0x1b   :  { %s442_s1 = scalar_lea.vmem %s20_s8, 128  ;;  %p447_p12 = scmp.lt.s32.totalorder %s20_s8, %s20_s8 }
  0x1c   :  { %p443_p11 = scmp.ne.s32.totalorder %s20_s8, %s442_s1  ;;  %p448_p13 = scmp.lt.s32.totalorder %s442_s1, %s442_s1 }
  0x1e   :  { %p449_p0 = por %p448_p13, %p447_p12 }
  0x20   :  { %p450_p1 = pnand %p449_p0, %p443_p11 }
  0x22   :  { %453 = shalt.err (!%p450_p1)
}
  0x23   :  { %22 = dma.hbm_to_vmem [thread:$0]  %s602_s0, 128, %s20_s8, [#allocation3]  }
  0x24   :  { %s454_s22 = scalar_lea.hbm %s605_s3, 1024 }
  0x25   :  { %p455_p2 = scmp.ne.s32.totalorder %s605_s3, %s454_s22  ;;  %p458_p3 = scmp.lt.u32.totalorder %s454_s22, %s605_s3 }
  0x27   :  { %p460_p4 = pnand %p458_p3, %p455_p2 }
  0x29   :  { %463 = shalt.err (!%p460_p4)
}
  0x2a   :  { %s464_s27 = scalar_lea.vmem %s43_s10, 1024  ;;  %p469_p6 = scmp.lt.s32.totalorder %s43_s10, %s43_s10 }
  0x2b   :  { %p465_p5 = scmp.ne.s32.totalorder %s43_s10, %s464_s27  ;;  %p470_p7 = scmp.lt.s32.totalorder %s464_s27, %s464_s27 }
  0x2d   :  { %p471_p8 = por %p470_p7, %p469_p6 }
  0x2f   :  { %p472_p9 = pnand %p471_p8, %p465_p5 }
  0x31   :  { %475 = shalt.err (!%p472_p9)
}
  0x32   :  { %48 = dma.hbm_to_vmem [thread:$0]  %s605_s3, 1024, %s43_s10, [#allocation6], %s505_s28, %s505_s28, %s506_s29  }
  0x33   :  { %498 = dma.done.wait [#allocation3], 128  }
  0x34   :  { %499 = vsyncadd [#allocation3], 4294967168 }
  0x35   :  { %500 = dma.done.wait [#allocation6], 2048  }
  0x36   :  { %501 = vsyncadd [#allocation6], 4294965248  ;;  %v509_v0 = vmov 0.0   ;;  %vm510_vm0 = vmmov 0   ;;  %v392_v1 = vld [vmem:[#allocation5] sm:$0xff]   ;;  %v393_v2 = vld [vmem:[#allocation5 + $0x8] sm:$0xff]  }
  0x37   :  { %344 = vmatprep.subr.bf16.mxu0 %v509_v0  ;;  %360 = vmatprep.mubr.msk.bf16.mxu0 %vm510_vm0, %v509_v0  ;;  %v394_v3 = vld [vmem:[#allocation5 + $0x10] sm:$0xff]   ;;  %v400_v4 = vld [vmem:[#allocation7] sm:$0xff]   ;;  %v395_v5 = vld [vmem:[#allocation5 + $0x18] sm:$0xff]  }
  0x38   :  { %364 = vmatprep.subr.bf16.mxu1 %v509_v0  ;;  %380 = vmatprep.mubr.msk.bf16.mxu1 %vm510_vm0, %v509_v0  ;;  %v401_v6 = vld [vmem:[#allocation7 + $0x8] sm:$0xff]   ;;  %v396_v7 = vld [vmem:[#allocation5 + $0x20] sm:$0xff]   ;;  %v402_v8 = vld [vmem:[#allocation7 + $0x10] sm:$0xff]  }
  0x39   :  { %345 = vmatpush3.bf16.msra.mxu0 %v392_v1  ;;  %365 = vmatpush3.bf16.msra.mxu1 %v400_v4  ;;  %v397_v9 = vld [vmem:[#allocation5 + $0x28] sm:$0xff]   ;;  %v403_v10 = vld [vmem:[#allocation7 + $0x18] sm:$0xff]   ;;  %v398_v11 = vld [vmem:[#allocation5 + $0x30] sm:$0xff]  }
  0x3a   :  { %346 = vmatprep.subr.bf16.mxu0 %v509_v0  ;;  %366 = vmatprep.subr.bf16.mxu1 %v509_v0  ;;  %v404_v12 = vld [vmem:[#allocation7 + $0x20] sm:$0xff]   ;;  %v399_v13 = vld [vmem:[#allocation5 + $0x38] sm:$0xff]   ;;  %v405_v15 = vld [vmem:[#allocation7 + $0x28] sm:$0xff]  }
  0x3b   :  { %v61_v14 = vld [vmem:[#allocation2] sm:$0xff]  ;;  %v406_v17 = vld [vmem:[#allocation7 + $0x30] sm:$0xff]  }
  0x3c   :  { %v62_v16 = vpack.c.bf16 %v61_v14, %v61_v14  ;;  %v407_v18 = vld [vmem:[#allocation7 + $0x38] sm:$0xff]  }
  0x3d   :  { %347 = vmatpush3.bf16.msra.mxu0 %v393_v2  ;;  %367 = vmatpush3.bf16.msra.mxu1 %v401_v6  ;;  %v308_v19 = vld [vmem:[%s604_s2] ss:$0 sm:$0xff]  ;;  %s511_s2 = smov [#allocation8]  }
  0x3e   :  { %348 = vmatprep.subr.bf16.mxu0 %v509_v0  ;;  %368 = vmatprep.subr.bf16.mxu1 %v509_v0  ;;  %v317_v27 = vld [vmem:[%s606_s4] ss:$0 sm:$0xff]  ;;  %s298_s7 = sshll.u32 %s511_s2, 4  ;;  %s299_s7 = int_to_ptr.vmem [resolvable:$true] %s298_s7 }
  0x3f   :  { %s476_s8 = scalar_lea.vmem %s299_s7, 128  ;;  %p481_p11 = scmp.lt.s32.totalorder %s299_s7, %s299_s7 }
  0x40   :  { %p477_p10 = scmp.ne.s32.totalorder %s299_s7, %s476_s8  ;;  %p482_p12 = scmp.lt.s32.totalorder %s476_s8, %s476_s8 }
  0x41   :  { %349 = vmatpush3.bf16.msra.mxu0 %v394_v3  ;;  %369 = vmatpush3.bf16.msra.mxu1 %v402_v8 }
  0x42   :  { %350 = vmatprep.subr.bf16.mxu0 %v509_v0  ;;  %370 = vmatprep.subr.bf16.mxu1 %v509_v0  ;;  %p483_p13 = por %p482_p12, %p481_p11 }
  0x44   :  { %p484_p0 = pnand %p483_p13, %p477_p10 }
  0x45   :  { %351 = vmatpush3.bf16.msra.mxu0 %v395_v5  ;;  %371 = vmatpush3.bf16.msra.mxu1 %v403_v10 }
  0x46   :  { %352 = vmatprep.subr.bf16.mxu0 %v509_v0  ;;  %372 = vmatprep.subr.bf16.mxu1 %v509_v0 }
  0x49   :  { %353 = vmatpush3.bf16.msra.mxu0 %v396_v7  ;;  %373 = vmatpush3.bf16.msra.mxu1 %v404_v12 }
  0x4a   :  { %354 = vmatprep.subr.bf16.mxu0 %v509_v0  ;;  %374 = vmatprep.subr.bf16.mxu1 %v509_v0 }
  0x4d   :  { %355 = vmatpush3.bf16.msra.mxu0 %v397_v9  ;;  %375 = vmatpush3.bf16.msra.mxu1 %v405_v15 }
  0x4e   :  { %356 = vmatprep.subr.bf16.mxu0 %v509_v0  ;;  %376 = vmatprep.subr.bf16.mxu1 %v509_v0 }
  0x51   :  { %357 = vmatpush3.bf16.msra.mxu0 %v398_v11  ;;  %377 = vmatpush3.bf16.msra.mxu1 %v406_v17 }
  0x52   :  { %358 = vmatprep.subr.bf16.mxu0 %v509_v0  ;;  %378 = vmatprep.subr.bf16.mxu1 %v509_v0 }
  0x55   :  { %359 = vmatpush3.bf16.msra.mxu0 %v399_v13  ;;  %379 = vmatpush3.bf16.msra.mxu1 %v407_v18 }
  0x58   :  { %361 = vmatmul.mubr.bf16.vlgmr.msra.gmra.mrb[0].mxu0 %v62_v16 }
 0x12b   :  { %v168_v20 = vpop.f32.mrb[0].mxu0 }
 0x12c   :  { %v169_v21 = vadd.f32 %v308_v19, %v168_v20  ;;  %v362_v22 = vpop.f32.mrb[1].mxu0 }
 0x12d   :  { %v171_v23 = vpop.f32.mrb[2].mxu0 }
 0x12e   :  { %v174_v24 = vmax.f32 %v169_v21, 0.0  ;;  %v363_v25 = vpop.f32.mrb[3].mxu0 }
 0x130   :  { %v175_v26 = vpack.c.bf16 %v174_v24, %v174_v24 }
 0x132   :  { %381 = vmatmul.mubr.bf16.vlgmr.msra.gmra.mrb[0].mxu1 %v175_v26 }
 0x205   :  { %v281_v28 = vpop.f32.mrb[0].mxu1 }
 0x206   :  { %v282_v29 = vadd.f32 %v317_v27, %v281_v28  ;;  %v382_v30 = vpop.f32.mrb[1].mxu1 }
 0x207   :  { %v284_v31 = vpop.f32.mrb[2].mxu1 }
 0x208   :  { %v287_v32 = vmul.f32 0.5, %v282_v29  ;;  %v383_v33 = vpop.f32.mrb[3].mxu1 }
 0x20a   :  { %408 = vtanh.f32 %v287_v32 }
 0x214   :  { %v409_v34 = vpop.eup %408 }
 0x215   :  { %v289_v35 = vadd.f32 1.0, %v409_v34 }
 0x217   :  { %v290_v36 = vmul.f32 0.5, %v289_v35 }
 0x219   :  { %291 = vst [vmem:[#allocation8] sm:$0xff] %v290_v36 }
 0x21a   :  { %487 = shalt.err (!%p484_p0)
}
 0x21b   :  { %s488_s10 = scalar_lea.hbm %s607_s5, 128 }
 0x21c   :  { %p489_p1 = scmp.ne.s32.totalorder %s607_s5, %s488_s10  ;;  %p492_p2 = scmp.lt.u32.totalorder %s488_s10, %s607_s5 }
 0x21e   :  { %p494_p3 = pnand %p492_p2, %p489_p1 }
 0x220   :  { %497 = shalt.err (!%p494_p3)
}
 0x221   :  { %301 = dma.vmem_to_hbm [thread:$0]  %s299_s7, 128, %s607_s5, [#allocation4]  }
 0x222   :  { %502 = dma.done.wait [#allocation4], 128  }
 0x223   :  { %503 = vsyncadd [#allocation4], 4294967168 }
 0x224   :  { %305 = vsyncpa [#allocation3], 1 }
 0x225   :  { %306 = vsyncpa [#allocation6], 1 }
 0x226   :  { %307 = vsyncpa [#allocation4], 1 }

</bundles_post_ra>
